<compile_context>
chip_gen: v7x
topology: tpu7x:2x2x1
jax: 0.10.0
libtpu: 0.0.40
codegen_flags: <defaults>
</compile_context>

<pallas_src>
import jax
import jax.numpy as jnp
from jax.experimental import pallas as pl
from jax.experimental.pallas import tpu as pltpu

_LANE = 1024            # lane-dense last dim (multiple of 128)
_MAX_BLOCK_ROWS = 512   # 512 x 1024 x 4B = 2 MiB per input block


def _mape_block_kernel(forecast_ref, target_ref, mask_ref, out_ref):
    """One independent block: masked percentage abs-error reduced to a scalar."""
    f = forecast_ref[...].astype(jnp.float32)
    tg = target_ref[...].astype(jnp.float32)
    m = mask_ref[...].astype(jnp.float32)

    # divide_no_nan: a/b with NaN -> 0 and +inf -> 0 (-inf intentionally kept,
    # matching the reference implementation exactly).
    w = m / tg
    w = jnp.where(jnp.isnan(w) | (w == jnp.inf), jnp.float32(0.0), w)

    vals = jnp.abs((f - tg) * w)
    out_ref[0, 0] = jnp.sum(vals)


def mape_loss(insample, freq, forecast, target, mask):
    """Pallas implementation of mape_loss.forward. Returns a scalar float32."""
    del insample, freq  # unused by the reference forward pass

    total = forecast.size                      # true element count (for mean)

    # ---- flatten + pad to a lane-dense (rows_padded, _LANE) layout ----------
    rows = pl.cdiv(total, _LANE)
    rows8 = pl.cdiv(rows, 8) * 8               # sublane alignment
    block_rows = min(_MAX_BLOCK_ROWS, rows8)
    rows_padded = pl.cdiv(rows8, block_rows) * block_rows
    padded_total = rows_padded * _LANE
    num_blocks = rows_padded // block_rows

    def _prep(x):
        x = jnp.ravel(x)
        pad = padded_total - total
        if pad:
            # pad with zeros: mask=0, target=0 -> weight 0 -> contributes 0
            x = jnp.pad(x, (0, pad))
        return x.reshape(rows_padded, _LANE)

    f2, t2, m2 = _prep(forecast), _prep(target), _prep(mask)

    elem_bytes = jnp.dtype(forecast.dtype).itemsize
    cost = pl.CostEstimate(
        flops=6 * padded_total,
        transcendentals=padded_total,                       # the divide
        bytes_accessed=3 * padded_total * elem_bytes + num_blocks * 4,
    )

    partials = pl.pallas_call(
        _mape_block_kernel,
        out_shape=jax.ShapeDtypeStruct((num_blocks, 1), jnp.float32),
        grid_spec=pltpu.PrefetchScalarGridSpec(
            num_scalar_prefetch=0,
            grid=(num_blocks,),
            in_specs=[
                pl.BlockSpec((block_rows, _LANE), lambda i: (i, 0)),  # forecast
                pl.BlockSpec((block_rows, _LANE), lambda i: (i, 0)),  # target
                pl.BlockSpec((block_rows, _LANE), lambda i: (i, 0)),  # mask
            ],
            out_specs=pl.BlockSpec(
                (1, 1), lambda i: (i, 0), memory_space=pltpu.SMEM
            ),
        ),
        compiler_params=pltpu.CompilerParams(
            # Independent per-block partials -> safe to shard across TCs (v7x).
            dimension_semantics=("parallel",),
            # 3 inputs x 2 buffers x 2 MiB = 12 MiB; 32 MiB is safe on
            # v5e (128 MiB phys), v6e (128 MiB) and v7x (64 MiB).
            vmem_limit_bytes=32 * 1024 * 1024,
        ),
        cost_estimate=cost,
    )(f2, t2, m2)

    return jnp.sum(partials) / jnp.float32(total)


def _mape_ref(forecast, target, mask):
    """Pure-JAX reference mirroring the PyTorch semantics."""
    w = mask / target
    w = jnp.where(jnp.isnan(w), 0.0, w)
    w = jnp.where(w == jnp.inf, 0.0, w)
    return jnp.mean(jnp.abs((forecast - target) * w))


if __name__ == "__main__":
    key = jax.random.PRNGKey(0)
    kf, kt, km, ki = jax.random.split(key, 4)

    # Small, deliberately non-tile-aligned (batch, time) to exercise padding.
    B, T = 6, 200

    forecast = jax.random.normal(kf, (B, T), dtype=jnp.float32)
    target = jax.random.normal(kt, (B, T), dtype=jnp.float32) + 3.0
    mask = (jax.random.uniform(km, (B, T)) > 0.2).astype(jnp.float32)
    # Zero out target where mask == 0 to exercise the 0/0 -> NaN -> 0 path.
    target = target * mask

    insample = jax.random.normal(ki, (B, T), dtype=jnp.float32)  # unused
    freq = 1  # unused

    loss = jax.block_until_ready(mape_loss(insample, freq, forecast, target, mask))
    ref = jax.block_until_ready(_mape_ref(forecast, target, mask))

    assert jnp.allclose(loss, ref, rtol=1e-5, atol=1e-6), (loss, ref)
    print("KERNEL_OK")
</pallas_src>

<mosaic_0001>
module attributes {stable_mosaic.version = 11 : i64} {
  func.func @_mape_block_kernel(%arg0: i32, %arg1: memref<8x1024xf32, #tpu.memory_space<vmem>>, %arg2: memref<8x1024xf32, #tpu.memory_space<vmem>>, %arg3: memref<8x1024xf32, #tpu.memory_space<vmem>>, %arg4: memref<1x1xf32, #tpu.memory_space<smem>>) attributes {dimension_semantics = [#tpu.dimension_semantics<parallel>], iteration_bounds = array<i64: 1>, scalar_prefetch = 0 : i64, scratch_operands = 0 : i64, tpu.core_type = #tpu.core_type<tc>, window_params = [{transform_indices = @transform_0, window_bounds = array<i64: 8, 1024>}, {transform_indices = @transform_1, window_bounds = array<i64: 8, 1024>}, {transform_indices = @transform_2, window_bounds = array<i64: 8, 1024>}, {transform_indices = @transform_3, window_bounds = array<i64: 1, 1>}]} {
    %c0 = arith.constant 0 : index
    %c0_0 = arith.constant 0 : index
    %0 = vector.load %arg1[%c0, %c0_0] : memref<8x1024xf32, #tpu.memory_space<vmem>>, vector<8x1024xf32>
    %c0_1 = arith.constant 0 : index
    %c0_2 = arith.constant 0 : index
    %1 = vector.load %arg2[%c0_1, %c0_2] : memref<8x1024xf32, #tpu.memory_space<vmem>>, vector<8x1024xf32>
    %c0_3 = arith.constant 0 : index
    %c0_4 = arith.constant 0 : index
    %2 = vector.load %arg3[%c0_3, %c0_4] : memref<8x1024xf32, #tpu.memory_space<vmem>>, vector<8x1024xf32>
    %3 = arith.divf %2, %1 : vector<8x1024xf32>
    %4 = arith.cmpf one, %3, %3 : vector<8x1024xf32>
    %cst = arith.constant 0x7F800000 : f32
    %5 = vector.broadcast %cst : f32 to vector<8x1024xf32>
    %6 = arith.cmpf oeq, %3, %5 : vector<8x1024xf32>
    %7 = arith.ori %4, %6 : vector<8x1024xi1>
    %cst_5 = arith.constant 0.000000e+00 : f32
    %8 = vector.broadcast %cst_5 : f32 to vector<8x1024xf32>
    %9 = arith.select %7, %8, %3 : vector<8x1024xi1>, vector<8x1024xf32>
    %10 = arith.subf %0, %1 : vector<8x1024xf32>
    %11 = arith.mulf %10, %9 : vector<8x1024xf32>
    %12 = math.absf %11 : vector<8x1024xf32>
    %13 = vector.shape_cast %12 : vector<8x1024xf32> to vector<1x8x1024xf32>
    %cst_6 = arith.constant dense<0.000000e+00> : vector<1xf32>
    %14 = vector.multi_reduction <add>, %13, %cst_6 [1, 2] : vector<1x8x1024xf32> to vector<1xf32>
    %15 = vector.shape_cast %14 : vector<1xf32> to vector<1x1x1xf32>
    %16 = vector.extract %15[0, 0, 0] : f32 from vector<1x1x1xf32>
    %c0_7 = arith.constant 0 : index
    %c0_8 = arith.constant 0 : index
    %17 = memref.load %arg4[%c0_7, %c0_8] : memref<1x1xf32, #tpu.memory_space<smem>>
    memref.store %16, %arg4[%c0_7, %c0_8] : memref<1x1xf32, #tpu.memory_space<smem>>
    return
  }
  func.func @transform_0(%arg0: i32) -> (i32, i32) {
    %c0_i32 = arith.constant 0 : i32
    %c0_i32_0 = arith.constant 0 : i32
    return %arg0, %c0_i32 : i32, i32
  }
  func.func @transform_1(%arg0: i32) -> (i32, i32) {
    %c0_i32 = arith.constant 0 : i32
    %c0_i32_0 = arith.constant 0 : i32
    return %arg0, %c0_i32 : i32, i32
  }
  func.func @transform_2(%arg0: i32) -> (i32, i32) {
    %c0_i32 = arith.constant 0 : i32
    %c0_i32_0 = arith.constant 0 : i32
    return %arg0, %c0_i32 : i32, i32
  }
  func.func @transform_3(%arg0: i32) -> (i32, i32) {
    %c0_i32 = arith.constant 0 : i32
    %c0_i32_0 = arith.constant 0 : i32
    return %arg0, %c0_i32 : i32, i32
  }
}

</mosaic_0001>

<bundles_post_ra>
// kernel: tpu_custom_call.1
= control target key start
LH: loop header
LB: loop body
LE: loop exit
PB: predicated region body
PF: predicated region fallthrough
CT: control target
= control target key end

     0   :  { %8 = vsyncpa [#allocation3], 0  ;;  %s435_s0 = inlined_call_operand.hbm [shape: f32[8,1024], index: 0, kind: input, shape index: {}]   ;;  %s436_s1 = inlined_call_operand.hbm [shape: f32[8,1024], index: 1, kind: input, shape index: {}]   ;;  %s437_s2 = inlined_call_operand.hbm [shape: f32[8,1024], index: 2, kind: input, shape index: {}]   ;;  %s438_s3 = inlined_call_operand.hbm [shape: f32[1,1], index: 3, kind: output, shape index: {}]  }
   0x1   :  { %9 = vsyncpa [#allocation6], 0 }
   0x2   :  { %10 = vsyncpa [#allocation4], 0  ;;  %s283_s12 = smov [#allocation5]   ;;  %s284_s14 = smov [#allocation2]  }
   0x3   :  { %s27_s13 = sshll.u32 %s283_s12, 4  ;;  %s17_s15 = sshll.u32 %s284_s14, 4  ;;  %s28_s13 = int_to_ptr.vmem [resolvable:$true] %s27_s13  ;;  %s18_s15 = int_to_ptr.vmem [resolvable:$true] %s17_s15 }
   0x4   :  { %s201_s18 = scalar_lea.hbm %s436_s1, 1024 }
   0x5   :  { %p202_p0 = scmp.ne.s32.totalorder %s436_s1, %s201_s18  ;;  %p205_p1 = scmp.lt.u32.totalorder %s201_s18, %s436_s1 }
   0x7   :  { %p207_p2 = pnand %p205_p1, %p202_p0 }
   0x9   :  { %210 = shalt.err (!%p207_p2)
}
   0xa   :  { %s211_s23 = scalar_lea.vmem %s28_s13, 1024  ;;  %p216_p4 = scmp.lt.s32.totalorder %s28_s13, %s28_s13 }
   0xb   :  { %p212_p3 = scmp.ne.s32.totalorder %s28_s13, %s211_s23  ;;  %p217_p5 = scmp.lt.s32.totalorder %s211_s23, %s211_s23 }
   0xd   :  { %p218_p6 = por %p217_p5, %p216_p4 }
   0xf   :  { %p219_p7 = pnand %p218_p6, %p212_p3 }
  0x11   :  { %222 = shalt.err (!%p219_p7)
}
  0x12   :  { %30 = dma.hbm_to_vmem [thread:$0]  %s436_s1, 1024, %s28_s13, [#allocation6]  }
  0x13   :  { %s223_s28 = scalar_lea.hbm %s435_s0, 1024 }
  0x14   :  { %p224_p8 = scmp.ne.s32.totalorder %s435_s0, %s223_s28  ;;  %p227_p9 = scmp.lt.u32.totalorder %s223_s28, %s435_s0 }
  0x16   :  { %p229_p10 = pnand %p227_p9, %p224_p8 }
  0x18   :  { %232 = shalt.err (!%p229_p10)
}
  0x19   :  { %s233_s6 = scalar_lea.vmem %s18_s15, 1024  ;;  %p238_p12 = scmp.lt.s32.totalorder %s18_s15, %s18_s15 }
  0x1a   :  { %p234_p11 = scmp.ne.s32.totalorder %s18_s15, %s233_s6  ;;  %p239_p13 = scmp.lt.s32.totalorder %s233_s6, %s233_s6 }
  0x1c   :  { %p240_p0 = por %p239_p13, %p238_p12 }
  0x1e   :  { %p241_p1 = pnand %p240_p0, %p234_p11 }
  0x20   :  { %244 = shalt.err (!%p241_p1)
}
  0x21   :  { %20 = dma.hbm_to_vmem [thread:$0]  %s435_s0, 1024, %s18_s15, [#allocation3]  }
  0x22   :  { %s285_s8 = smov [#allocation7]   ;;  %s245_s12 = scalar_lea.hbm %s437_s2, 1024 }
  0x23   :  { %s37_s9 = sshll.u32 %s285_s8, 4  ;;  %p246_p2 = scmp.ne.s32.totalorder %s437_s2, %s245_s12  ;;  %s38_s9 = int_to_ptr.vmem [resolvable:$true] %s37_s9 }
  0x24   :  { %p249_p3 = scmp.lt.u32.totalorder %s245_s12, %s437_s2 }
  0x26   :  { %p251_p4 = pnand %p249_p3, %p246_p2 }
  0x28   :  { %254 = shalt.err (!%p251_p4)
}
  0x29   :  { %s255_s18 = scalar_lea.vmem %s38_s9, 1024  ;;  %p260_p6 = scmp.lt.s32.totalorder %s38_s9, %s38_s9 }
  0x2a   :  { %p256_p5 = scmp.ne.s32.totalorder %s38_s9, %s255_s18  ;;  %p261_p7 = scmp.lt.s32.totalorder %s255_s18, %s255_s18 }
  0x2c   :  { %p262_p8 = por %p261_p7, %p260_p6 }
  0x2e   :  { %p263_p9 = pnand %p262_p8, %p256_p5 }
  0x30   :  { %266 = shalt.err (!%p263_p9)
}
  0x31   :  { %40 = dma.hbm_to_vmem [thread:$0]  %s437_s2, 1024, %s38_s9, [#allocation6]  }
  0x32   :  { %277 = dma.done.wait [#allocation3], 1024  }
  0x33   :  { %278 = vsyncadd [#allocation3], 4294966272 }
  0x34   :  { %279 = dma.done.wait [#allocation6], 2048  }
  0x35   :  { %280 = vsyncadd [#allocation6], 4294965248  ;;  %v343_v0 = vld [vmem:[#allocation5] sm:$0xff]  ;;  %v345_v1 = vld [vmem:[#allocation5 + $0x8] sm:$0xff]  ;;  %s267_s21 = scalar_lea.hbm %s438_s3, 16 }
  0x36   :  { %v347_v2 = vld [vmem:[#allocation5 + $0x10] sm:$0xff]  ;;  %v349_v3 = vld [vmem:[#allocation5 + $0x18] sm:$0xff]  ;;  %185 = vrcp.f32 %v343_v0  ;;  %v352_v4 = vld [vmem:[#allocation5 + $0x20] sm:$0xff]  ;;  %p268_p10 = scmp.ne.s32.totalorder %s438_s3, %s267_s21  ;;  %p271_p11 = scmp.lt.u32.totalorder %s267_s21, %s438_s3 }
  0x37   :  { %187 = vrcp.f32 %v345_v1  ;;  %v355_v5 = vld [vmem:[#allocation5 + $0x28] sm:$0xff]  ;;  %v358_v6 = vld [vmem:[#allocation5 + $0x30] sm:$0xff]  ;;  %v361_v7 = vld [vmem:[#allocation5 + $0x38] sm:$0xff] }
  0x38   :  { %189 = vrcp.f32 %v347_v2  ;;  %v66_v8 = vld [vmem:[#allocation7] sm:$0xff]  ;;  %v367_v10 = vld [vmem:[#allocation2 + $0x8] sm:$0xff]  ;;  %v369_v13 = vld [vmem:[#allocation2 + $0x10] sm:$0xff]  ;;  %p273_p12 = pnand %p271_p11, %p268_p10 }
  0x39   :  { %191 = vrcp.f32 %v349_v3  ;;  %v50_v9 = vld [vmem:[#allocation2] sm:$0xff]  ;;  %v67_v11 = vld [vmem:[#allocation7 + $0x8] sm:$0xff]  ;;  %v68_v14 = vld [vmem:[#allocation7 + $0x10] sm:$0xff]  ;;  %v123_v23 = vsub.f32 %v367_v10, %v345_v1  ;;  %v124_v27 = vsub.f32 %v369_v13, %v347_v2 }
  0x3a   :  { %193 = vrcp.f32 %v352_v4  ;;  %v53_v16 = vld [vmem:[#allocation2 + $0x18] sm:$0xff]  ;;  %v70_v20 = vld [vmem:[#allocation7 + $0x20] sm:$0xff]  ;;  %v122_v22 = vsub.f32 %v50_v9, %v343_v0  ;;  %v71_v25 = vld [vmem:[#allocation7 + $0x28] sm:$0xff] }
  0x3b   :  { %195 = vrcp.f32 %v355_v5  ;;  %v69_v17 = vld [vmem:[#allocation7 + $0x18] sm:$0xff]  ;;  %v72_v29 = vld [vmem:[#allocation7 + $0x30] sm:$0xff]  ;;  %v125_v32 = vsub.f32 %v53_v16, %v349_v3  ;;  %v54_v39 = vld [vmem:[#allocation2 + $0x20] sm:$0xff] }
  0x3c   :  { %197 = vrcp.f32 %v358_v6  ;;  %v73_v34 = vld [vmem:[#allocation7 + $0x38] sm:$0xff]  ;;  %v55_v47 = vld [vmem:[#allocation2 + $0x28] sm:$0xff]  ;;  %v126_v52 = vsub.f32 %v54_v39, %v352_v4  ;;  %v56_v54 = vld [vmem:[#allocation2 + $0x30] sm:$0xff] }
  0x3d   :  { %199 = vrcp.f32 %v361_v7  ;;  %v127_v58 = vsub.f32 %v55_v47, %v355_v5  ;;  %v57_v61 = vld [vmem:[#allocation2 + $0x38] sm:$0xff]  ;;  %v128_v0 = vsub.f32 %v56_v54, %v358_v6 }
  0x40   :  { %v186_v12 = vpop.eup %185 }
  0x41   :  { %v188_v15 = vpop.eup %187  ;;  %v75_v18 = vmul.f32 %v186_v12, %v66_v8  ;;  %v129_v8 = vsub.f32 %v57_v61, %v361_v7 }
  0x42   :  { %v190_v19 = vpop.eup %189  ;;  %v77_v21 = vmul.f32 %v188_v15, %v67_v11 }
  0x43   :  { %v192_v24 = vpop.eup %191  ;;  %v79_v26 = vmul.f32 %v190_v19, %v68_v14  ;;  %vm90_vm0 = vcmp.ne.f32.partialorder %v75_v18, %v75_v18  ;;  %vm98_vm1 = vcmp.eq.f32.partialorder %v75_v18, inf }
  0x44   :  { %v194_v28 = vpop.eup %193  ;;  %v81_v30 = vmul.f32 %v192_v24, %v69_v17  ;;  %vm91_vm2 = vcmp.ne.f32.partialorder %v77_v21, %v77_v21  ;;  %vm99_vm3 = vcmp.eq.f32.partialorder %v77_v21, inf  ;;  %vm376_vm4 = vmor %vm90_vm0, %vm98_vm1 }
  0x45   :  { %v196_v33 = vpop.eup %195  ;;  %v83_v35 = vmul.f32 %v194_v28, %v70_v20  ;;  %vm92_vm5 = vcmp.ne.f32.partialorder %v79_v26, %v79_v26  ;;  %vm100_vm6 = vcmp.eq.f32.partialorder %v79_v26, inf  ;;  %vm381_vm7 = vmor %vm91_vm2, %vm99_vm3  ;;  %v114_v37 = vsel %vm376_vm4, 0.0, %v75_v18 }
  0x46   :  { %v198_v38 = vpop.eup %197  ;;  %v85_v40 = vmul.f32 %v196_v33, %v71_v25  ;;  %vm93_vm8 = vcmp.ne.f32.partialorder %v81_v30, %v81_v30  ;;  %vm101_vm9 = vcmp.eq.f32.partialorder %v81_v30, inf  ;;  %vm387_vm10 = vmor %vm92_vm5, %vm100_vm6  ;;  %v115_v42 = vsel %vm381_vm7, 0.0, %v77_v21 }
  0x47   :  { %v200_v43 = vpop.eup %199  ;;  %v87_v44 = vmul.f32 %v198_v38, %v72_v29  ;;  %vm94_vm11 = vcmp.ne.f32.partialorder %v83_v35, %v83_v35  ;;  %vm102_vm12 = vcmp.eq.f32.partialorder %v83_v35, inf  ;;  %vm393_vm13 = vmor %vm93_vm8, %vm101_vm9  ;;  %v116_v46 = vsel %vm387_vm10, 0.0, %v79_v26 }
  0x48   :  { %v89_v48 = vmul.f32 %v200_v43, %v73_v34  ;;  %vm95_vm14 = vcmp.ne.f32.partialorder %v85_v40, %v85_v40  ;;  %vm103_vm15 = vcmp.eq.f32.partialorder %v85_v40, inf  ;;  %vm399_vm0 = vmor %vm94_vm11, %vm102_vm12  ;;  %v117_v50 = vsel %vm393_vm13, 0.0, %v81_v30 }
  0x49   :  { %vm96_vm1 = vcmp.ne.f32.partialorder %v87_v44, %v87_v44  ;;  %vm104_vm2 = vcmp.eq.f32.partialorder %v87_v44, inf  ;;  %vm405_vm3 = vmor %vm95_vm14, %vm103_vm15  ;;  %v130_v53 = vmul.f32 %v122_v22, %v114_v37  ;;  %v118_v55 = vsel %vm399_vm0, 0.0, %v83_v35 }
  0x4a   :  { %vm97_vm4 = vcmp.ne.f32.partialorder %v89_v48, %v89_v48  ;;  %vm105_vm5 = vcmp.eq.f32.partialorder %v89_v48, inf  ;;  %v131_v56 = vmul.f32 %v123_v23, %v115_v42  ;;  %vm412_vm6 = vmor %vm96_vm1, %vm104_vm2  ;;  %v132_v59 = vmul.f32 %v124_v27, %v116_v46 }
  0x4b   :  { %v133_v60 = vmul.f32 %v125_v32, %v117_v50  ;;  %v119_v62 = vsel %vm405_vm3, 0.0, %v85_v40  ;;  %v138_v63 = vand.u32 2147483647, %v130_v53  ;;  %vm113_vm7 = vmor %vm97_vm4, %vm105_vm5  ;;  %v134_v1 = vmul.f32 %v126_v52, %v118_v55 }
  0x4c   :  { %v139_v2 = vand.u32 2147483647, %v131_v56  ;;  %v140_v3 = vand.u32 2147483647, %v132_v59  ;;  %v120_v4 = vsel %vm412_vm6, 0.0, %v87_v44  ;;  %v135_v9 = vmul.f32 %v127_v58, %v119_v62 }
  0x4d   :  { %v141_v5 = vand.u32 2147483647, %v133_v60  ;;  %v121_v11 = vsel %vm113_vm7, 0.0, %v89_v48  ;;  %v136_v12 = vmul.f32 %v128_v0, %v120_v4  ;;  %v142_v13 = vand.u32 2147483647, %v134_v1 }
  0x4e   :  { %v146_v10 = vadd.f32 %v139_v2, %v138_v63  ;;  %v137_v15 = vmul.f32 %v129_v8, %v121_v11  ;;  %v143_v16 = vand.u32 2147483647, %v135_v9 }
  0x4f   :  { %v144_v18 = vand.u32 2147483647, %v136_v12 }
  0x50   :  { %v147_v14 = vadd.f32 %v146_v10, %v140_v3  ;;  %v145_v19 = vand.u32 2147483647, %v137_v15 }
  0x52   :  { %v148_v17 = vadd.f32 %v147_v14, %v141_v5 }
  0x54   :  { %v149_v6 = vadd.f32 %v148_v17, %v142_v13 }
  0x56   :  { %v150_v20 = vadd.f32 %v149_v6, %v143_v16 }
  0x58   :  { %v151_v21 = vadd.f32 %v150_v20, %v144_v18 }
  0x5a   :  { %v152_v22 = vadd.f32 %v151_v21, %v145_v19 }
  0x5c   :  { %153 = vadd.xlane.f32.xlu0 %v152_v22 }
  0xe9   :  { %v154_v23 = vpop.xlane.xlu0 %153 }
  0xea   :  { %v155_v24 = vrot.slane %v154_v23, 4 }
  0xec   :  { %v156_v7 = vadd.f32 %v155_v24, %v154_v23 }
  0xee   :  { %v157_v25 = vrot.slane %v156_v7, 2 }
  0xf0   :  { %v158_v26 = vadd.f32 %v157_v25, %v156_v7 }
  0xf2   :  { %v159_v27 = vrot.slane %v158_v26, 1 }
  0xf4   :  { %v160_v28 = vadd.f32 %v159_v27, %v158_v26 }
  0xf6   :  { %179 = vpush %v160_v28 }
 0x127   :  { %s180_s2 = spop %179 }
 0x128   :  { %163 = sst [smem:[#allocation8]] %s180_s2 }
 0x129   :  { %276 = shalt.err (!%p273_p12)
}
 0x12a   :  { %s286_s26 = smov [#allocation8]  }
 0x12b   :  { %171 = dma.smem_to_hbm %s286_s26, 16, %s438_s3, [#allocation4]  }
 0x12c   :  { %281 = dma.done.wait [#allocation4], 16  }
 0x12d   :  { %282 = vsyncadd [#allocation4], 4294967280 }
 0x12e   :  { %175 = sfence }
 0x12f   :  { %176 = vsyncpa [#allocation3], 1 }
 0x130   :  { %177 = vsyncpa [#allocation6], 1 }
 0x131   :  { %178 = vsyncpa [#allocation4], 1 }

</bundles_post_ra>
